<compile_context>
chip_gen: v6e
topology: v6e:2x2x1
jax: 0.10.0
libtpu: 0.0.40
codegen_flags: <defaults>
</compile_context>

<pallas_src>
import jax
import jax.numpy as jnp
from jax.experimental import pallas as pl
from jax.experimental.pallas import tpu as pltpu


L = 4
INPUT_DIM = 40
NEG_SLOPE = 0.01                  # F.leaky_relu default negative_slope
TB_MAX = 32768                    # batch tile (lanes); multiple of 128
MIN_STEPS_PER_CORE = 4            # v7x: give each TensorCore >= 4 tiles
VMEM_LIMIT_BYTES = 48 * 1024 * 1024   # < 64 MiB physical VMEM on v7x


def _leaky_relu(y):
    return jnp.where(y > 0, y, NEG_SLOPE * y)


def mlp_kernel(x_ref,
               w0_ref, b0_ref,
               w1_ref, b1_ref,
               w2_ref, b2_ref,
               w3_ref, b3_ref,
               w4_ref, b4_ref,
               out_ref):
    # x_ref: (input_dim, TB) -- batch on the 128-wide lane axis, possibly
    # bf16.  No transpose and no full-tile upcast: the bf16 tile goes
    # straight into the MXU with f32 accumulation.
    y = x_ref[...]

    # 4 hidden layers: y <- leaky_relu(W @ y + b); every intermediate is
    # (out_features, TB) f32, lane-dense.
    # TODO(synk): if a v7x bundle shows the 5 serially-dependent tiny
    # vmatmuls binding, convert the last 2-3 layers (K<=10, M<=5) to VPU
    # broadcast-FMA (stride-0 pl.ds weight-row broadcast) instead of MXU dots.
    for w_ref, b_ref in ((w0_ref, b0_ref), (w1_ref, b1_ref),
                         (w2_ref, b2_ref), (w3_ref, b3_ref)):
        y = _leaky_relu(
            jnp.dot(w_ref[...], y, preferred_element_type=jnp.float32)
            + b_ref[...])

    # Output layer + sigmoid; (3, TB) lane-dense unmasked store.
    y = jnp.dot(w4_ref[...], y, preferred_element_type=jnp.float32) + b4_ref[...]
    out_ref[...] = jax.nn.sigmoid(y)


def make_params(key, input_dim=INPUT_DIM, n_layers=L):
    """Deterministic synthetic parameters in PyTorch nn.Linear layout.

    layer l (0..L-1): Linear(input_dim // 2**l -> input_dim // 2**(l+1))
    layer L        : Linear(input_dim // 2**L -> 3)
    Weights are (out_features, in_features), biases (out_features,); the
    kernel uses them as-is (W @ y), so no transpose anywhere.
    """
    dims = [input_dim // (2 ** l) for l in range(n_layers + 1)] + [3]
    params = []
    for l in range(n_layers + 1):
        fan_in, fan_out = dims[l], dims[l + 1]
        key, kw, kb = jax.random.split(key, 3)
        bound = 1.0 / jnp.sqrt(jnp.float32(fan_in))
        w = jax.random.uniform(kw, (fan_out, fan_in), jnp.float32, -bound, bound)
        b = jax.random.uniform(kb, (fan_out,), jnp.float32, -bound, bound)
        params.append((w, b))
    return params


def _target_cores():
    """(dimension_semantics for the batch axis, #TensorCores to target).

    v7x has 2 TensorCores/chip; only CORE_PARALLEL actually shards a grid
    axis across them (the string "parallel" is a measured near-no-op).  On
    single-TC v5e/v6e we keep the portable "parallel".
    """
    try:
        kind = jax.devices()[0].device_kind.lower()
    except Exception:
        kind = ""
    if ("v7" in kind or "7x" in kind) and hasattr(pltpu, "CORE_PARALLEL"):
        return pltpu.CORE_PARALLEL, 2
    return "parallel", 1


def _choose_tb(batch, tb_max, num_cores):
    """Batch tile (lanes): as big as possible, but on multi-TC chips keep
    enough grid steps that every core gets >= MIN_STEPS_PER_CORE tiles."""
    assert tb_max % 128 == 0 and tb_max >= 128
    if num_cores <= 1:
        return batch if batch <= tb_max else tb_max
    want_steps = num_cores * MIN_STEPS_PER_CORE
    tb = min(tb_max, max(128, (batch // want_steps) // 128 * 128))
    return batch if batch <= tb else tb


def mlp_forward(x, params, *, tb_max=TB_MAX, stream_dtype=jnp.bfloat16,
                return_feature_major=False):
    """x: (input_dim, B) float32.  Returns torch-style squeezed (B, 3) output
    (f32), or the kernel's native lane-dense (3, B) if return_feature_major.
    """
    input_dim, batch = x.shape

    sem, n_cores = _target_cores()
    tb = _choose_tb(batch, tb_max, n_cores)
    grid = (pl.cdiv(batch, tb),)
    if grid[0] < 2:
        sem = "parallel"   # nothing to shard across cores with a single step

    # x streamed in stream_dtype (bf16 by default -> half the dominant HBM
    # read); weights cast the same way (they are tiny and VMEM-resident);
    # biases stay f32 so the bias-add / activations are f32 end-to-end.
    flat_args = [x.astype(stream_dtype)]
    # NOTE: default double-buffering already saturates HBM here; add
    # pipeline_mode=pl.Buffered(3) on this spec only if xprof shows exposed DMA.
    in_specs = [pl.BlockSpec((input_dim, tb), lambda i: (0, i))]
    for w, b in params:
        fan_out, fan_in = w.shape
        flat_args.append(w.astype(stream_dtype))
        flat_args.append(b.astype(jnp.float32).reshape(fan_out, 1))
        # Full-array blocks with constant index_maps -> weights/biases stay
        # resident in VMEM across the whole batch grid (no per-step re-DMA).
        in_specs.append(pl.BlockSpec((fan_out, fan_in), lambda i: (0, 0)))
        in_specs.append(pl.BlockSpec((fan_out, 1), lambda i: (0, 0)))

    out = pl.pallas_call(
        mlp_kernel,
        out_shape=jax.ShapeDtypeStruct((3, batch), jnp.float32),
        grid=grid,
        in_specs=in_specs,
        out_specs=pl.BlockSpec((3, tb), lambda i: (0, i)),
        compiler_params=pltpu.CompilerParams(
            dimension_semantics=(sem,),          # CORE_PARALLEL on v7x
            vmem_limit_bytes=VMEM_LIMIT_BYTES),  # headroom for huge tiles
    )(*flat_args)

    if return_feature_major:
        return out                    # (3, B): skip the transpose pass entirely
    # Back to torch orientation (B, 3), then torch-style .squeeze().
    return jnp.squeeze(out.T)


def mlp_reference(x, params):
    """Plain-JAX f32 mirror of the PyTorch forward (weights in (out,in) layout)."""
    y = x.T
    for l in range(L):
        w, b = params[l]
        y = _leaky_relu(y @ w.T + b)
    w, b = params[L]
    y = y @ w.T + b
    return jnp.squeeze(jax.nn.sigmoid(y))


if __name__ == "__main__":
    params = make_params(jax.random.PRNGKey(0))
    key = jax.random.PRNGKey(0)

    # 1) Exact-path check: f32 streaming, small batch, single tile.
    key, kx = jax.random.split(key)
    batch = 8
    x = jax.random.normal(kx, (INPUT_DIM, batch), jnp.float32)
    out = jax.block_until_ready(mlp_forward(x, params, stream_dtype=jnp.float32))
    ref = mlp_reference(x, params)
    assert out.shape == ref.shape == (batch, 3), (out.shape, ref.shape)
    assert jnp.allclose(out, ref, atol=1e-5, rtol=1e-5), "f32 mismatch vs reference"

    # 2) Production path: bf16 streaming over a pipelined multi-tile grid with
    #    a padded (non-128-multiple) last tile.  tb_max is overridden only to
    #    exercise the pipeline at demo size; production uses TB_MAX=32768.
    key, kx2 = jax.random.split(key)
    batch2 = 1187
    x2 = jax.random.normal(kx2, (INPUT_DIM, batch2), jnp.float32)
    out2 = jax.block_until_ready(mlp_forward(x2, params, tb_max=512))
    ref2 = mlp_reference(x2, params)
    assert out2.shape == ref2.shape == (batch2, 3), (out2.shape, ref2.shape)
    # bf16 inputs/weights (f32 MXU accumulation) => loosened tolerance.
    assert jnp.allclose(out2, ref2, atol=2e-2, rtol=2e-2), "bf16 mismatch vs reference"

    print("KERNEL_OK")
</pallas_src>

<mosaic_0001>
module attributes {stable_mosaic.version = 11 : i64} {
  func.func @mlp_kernel(%arg0: i32, %arg1: memref<40x8xf32, #tpu.memory_space<vmem>>, %arg2: memref<20x40xf32, #tpu.memory_space<vmem>>, %arg3: memref<20x1xf32, #tpu.memory_space<vmem>>, %arg4: memref<10x20xf32, #tpu.memory_space<vmem>>, %arg5: memref<10x1xf32, #tpu.memory_space<vmem>>, %arg6: memref<5x10xf32, #tpu.memory_space<vmem>>, %arg7: memref<5x1xf32, #tpu.memory_space<vmem>>, %arg8: memref<2x5xf32, #tpu.memory_space<vmem>>, %arg9: memref<2x1xf32, #tpu.memory_space<vmem>>, %arg10: memref<3x2xf32, #tpu.memory_space<vmem>>, %arg11: memref<3x1xf32, #tpu.memory_space<vmem>>, %arg12: memref<3x8xf32, #tpu.memory_space<vmem>>) attributes {dimension_semantics = [#tpu.dimension_semantics<parallel>], iteration_bounds = array<i64: 1>, scalar_prefetch = 0 : i64, scratch_operands = 0 : i64, tpu.core_type = #tpu.core_type<tc>, window_params = [{transform_indices = @transform_0, window_bounds = array<i64: 40, 8>}, {pipeline_mode = #tpu.pipeline_mode<synchronous>, transform_indices = @transform_1, window_bounds = array<i64: 20, 40>}, {pipeline_mode = #tpu.pipeline_mode<synchronous>, transform_indices = @transform_2, window_bounds = array<i64: 20, 1>}, {pipeline_mode = #tpu.pipeline_mode<synchronous>, transform_indices = @transform_3, window_bounds = array<i64: 10, 20>}, {pipeline_mode = #tpu.pipeline_mode<synchronous>, transform_indices = @transform_4, window_bounds = array<i64: 10, 1>}, {pipeline_mode = #tpu.pipeline_mode<synchronous>, transform_indices = @transform_5, window_bounds = array<i64: 5, 10>}, {pipeline_mode = #tpu.pipeline_mode<synchronous>, transform_indices = @transform_6, window_bounds = array<i64: 5, 1>}, {pipeline_mode = #tpu.pipeline_mode<synchronous>, transform_indices = @transform_7, window_bounds = array<i64: 2, 5>}, {pipeline_mode = #tpu.pipeline_mode<synchronous>, transform_indices = @transform_8, window_bounds = array<i64: 2, 1>}, {pipeline_mode = #tpu.pipeline_mode<synchronous>, transform_indices = @transform_9, window_bounds = array<i64: 3, 2>}, {pipeline_mode = #tpu.pipeline_mode<synchronous>, transform_indices = @transform_10, window_bounds = array<i64: 3, 1>}, {transform_indices = @transform_11, window_bounds = array<i64: 3, 8>}]} {
    %c0 = arith.constant 0 : index
    %c0_0 = arith.constant 0 : index
    %0 = vector.load %arg1[%c0, %c0_0] : memref<40x8xf32, #tpu.memory_space<vmem>>, vector<40x8xf32>
    %c0_1 = arith.constant 0 : index
    %c0_2 = arith.constant 0 : index
    %1 = vector.load %arg2[%c0_1, %c0_2] : memref<20x40xf32, #tpu.memory_space<vmem>>, vector<20x40xf32>
    %cst = arith.constant dense<0.000000e+00> : vector<20x8xf32>
    %2 = tpu.matmul %1, %0, %cst {dimension_numbers = #tpu.dot_dimension_numbers<[1], [0], [0], [1], [0, 0, 1, 1], [], []>} : vector<20x40xf32>, vector<40x8xf32>, vector<20x8xf32> -> vector<20x8xf32>
    %c0_3 = arith.constant 0 : index
    %c0_4 = arith.constant 0 : index
    %3 = vector.load %arg3[%c0_3, %c0_4] : memref<20x1xf32, #tpu.memory_space<vmem>>, vector<20x1xf32>
    %4 = vector.broadcast %3 : vector<20x1xf32> to vector<20x8xf32>
    %5 = arith.addf %2, %4 : vector<20x8xf32>
    %cst_5 = arith.constant 0.000000e+00 : f32
    %6 = vector.broadcast %cst_5 : f32 to vector<20x8xf32>
    %7 = arith.cmpf ogt, %5, %6 : vector<20x8xf32>
    %cst_6 = arith.constant 0.00999999977 : f32
    %8 = vector.broadcast %cst_6 : f32 to vector<20x8xf32>
    %9 = arith.mulf %8, %5 : vector<20x8xf32>
    %10 = arith.select %7, %5, %9 : vector<20x8xi1>, vector<20x8xf32>
    %c0_7 = arith.constant 0 : index
    %c0_8 = arith.constant 0 : index
    %11 = vector.load %arg4[%c0_7, %c0_8] : memref<10x20xf32, #tpu.memory_space<vmem>>, vector<10x20xf32>
    %cst_9 = arith.constant dense<0.000000e+00> : vector<10x8xf32>
    %12 = tpu.matmul %11, %10, %cst_9 {dimension_numbers = #tpu.dot_dimension_numbers<[1], [0], [0], [1], [0, 0, 1, 1], [], []>} : vector<10x20xf32>, vector<20x8xf32>, vector<10x8xf32> -> vector<10x8xf32>
    %c0_10 = arith.constant 0 : index
    %c0_11 = arith.constant 0 : index
    %13 = vector.load %arg5[%c0_10, %c0_11] : memref<10x1xf32, #tpu.memory_space<vmem>>, vector<10x1xf32>
    %14 = vector.broadcast %13 : vector<10x1xf32> to vector<10x8xf32>
    %15 = arith.addf %12, %14 : vector<10x8xf32>
    %cst_12 = arith.constant 0.000000e+00 : f32
    %16 = vector.broadcast %cst_12 : f32 to vector<10x8xf32>
    %17 = arith.cmpf ogt, %15, %16 : vector<10x8xf32>
    %cst_13 = arith.constant 0.00999999977 : f32
    %18 = vector.broadcast %cst_13 : f32 to vector<10x8xf32>
    %19 = arith.mulf %18, %15 : vector<10x8xf32>
    %20 = arith.select %17, %15, %19 : vector<10x8xi1>, vector<10x8xf32>
    %c0_14 = arith.constant 0 : index
    %c0_15 = arith.constant 0 : index
    %21 = vector.load %arg6[%c0_14, %c0_15] : memref<5x10xf32, #tpu.memory_space<vmem>>, vector<5x10xf32>
    %cst_16 = arith.constant dense<0.000000e+00> : vector<5x8xf32>
    %22 = tpu.matmul %21, %20, %cst_16 {dimension_numbers = #tpu.dot_dimension_numbers<[1], [0], [0], [1], [0, 0, 1, 1], [], []>} : vector<5x10xf32>, vector<10x8xf32>, vector<5x8xf32> -> vector<5x8xf32>
    %c0_17 = arith.constant 0 : index
    %c0_18 = arith.constant 0 : index
    %23 = vector.load %arg7[%c0_17, %c0_18] : memref<5x1xf32, #tpu.memory_space<vmem>>, vector<5x1xf32>
    %24 = vector.broadcast %23 : vector<5x1xf32> to vector<5x8xf32>
    %25 = arith.addf %22, %24 : vector<5x8xf32>
    %cst_19 = arith.constant 0.000000e+00 : f32
    %26 = vector.broadcast %cst_19 : f32 to vector<5x8xf32>
    %27 = arith.cmpf ogt, %25, %26 : vector<5x8xf32>
    %cst_20 = arith.constant 0.00999999977 : f32
    %28 = vector.broadcast %cst_20 : f32 to vector<5x8xf32>
    %29 = arith.mulf %28, %25 : vector<5x8xf32>
    %30 = arith.select %27, %25, %29 : vector<5x8xi1>, vector<5x8xf32>
    %c0_21 = arith.constant 0 : index
    %c0_22 = arith.constant 0 : index
    %31 = vector.load %arg8[%c0_21, %c0_22] : memref<2x5xf32, #tpu.memory_space<vmem>>, vector<2x5xf32>
    %cst_23 = arith.constant dense<0.000000e+00> : vector<2x8xf32>
    %32 = tpu.matmul %31, %30, %cst_23 {dimension_numbers = #tpu.dot_dimension_numbers<[1], [0], [0], [1], [0, 0, 1, 1], [], []>} : vector<2x5xf32>, vector<5x8xf32>, vector<2x8xf32> -> vector<2x8xf32>
    %c0_24 = arith.constant 0 : index
    %c0_25 = arith.constant 0 : index
    %33 = vector.load %arg9[%c0_24, %c0_25] : memref<2x1xf32, #tpu.memory_space<vmem>>, vector<2x1xf32>
    %34 = vector.broadcast %33 : vector<2x1xf32> to vector<2x8xf32>
    %35 = arith.addf %32, %34 : vector<2x8xf32>
    %cst_26 = arith.constant 0.000000e+00 : f32
    %36 = vector.broadcast %cst_26 : f32 to vector<2x8xf32>
    %37 = arith.cmpf ogt, %35, %36 : vector<2x8xf32>
    %cst_27 = arith.constant 0.00999999977 : f32
    %38 = vector.broadcast %cst_27 : f32 to vector<2x8xf32>
    %39 = arith.mulf %38, %35 : vector<2x8xf32>
    %40 = arith.select %37, %35, %39 : vector<2x8xi1>, vector<2x8xf32>
    %c0_28 = arith.constant 0 : index
    %c0_29 = arith.constant 0 : index
    %41 = vector.load %arg10[%c0_28, %c0_29] : memref<3x2xf32, #tpu.memory_space<vmem>>, vector<3x2xf32>
    %cst_30 = arith.constant dense<0.000000e+00> : vector<3x8xf32>
    %42 = tpu.matmul %41, %40, %cst_30 {dimension_numbers = #tpu.dot_dimension_numbers<[1], [0], [0], [1], [0, 0, 1, 1], [], []>} : vector<3x2xf32>, vector<2x8xf32>, vector<3x8xf32> -> vector<3x8xf32>
    %c0_31 = arith.constant 0 : index
    %c0_32 = arith.constant 0 : index
    %43 = vector.load %arg11[%c0_31, %c0_32] : memref<3x1xf32, #tpu.memory_space<vmem>>, vector<3x1xf32>
    %44 = vector.broadcast %43 : vector<3x1xf32> to vector<3x8xf32>
    %45 = arith.addf %42, %44 : vector<3x8xf32>
    %46 = arith.negf %45 : vector<3x8xf32>
    %47 = math.exp %46 : vector<3x8xf32>
    %cst_33 = arith.constant 1.000000e+00 : f32
    %48 = vector.broadcast %cst_33 : f32 to vector<3x8xf32>
    %49 = arith.addf %48, %47 : vector<3x8xf32>
    %50 = arith.divf %48, %49 : vector<3x8xf32>
    %c0_34 = arith.constant 0 : index
    %c0_35 = arith.constant 0 : index
    %51 = vector.load %arg12[%c0_34, %c0_35] : memref<3x8xf32, #tpu.memory_space<vmem>>, vector<3x8xf32>
    tpu.vector_store %arg12[%c0_34, %c0_35], %50 {strides = array<i32>} : memref<3x8xf32, #tpu.memory_space<vmem>>, vector<3x8xf32>,
    return
  }
  func.func @transform_0(%arg0: i32) -> (i32, i32) {
    %c0_i32 = arith.constant 0 : i32
    %c0_i32_0 = arith.constant 0 : i32
    return %c0_i32, %arg0 : i32, i32
  }
  func.func @transform_1(%arg0: i32) -> (i32, i32) {
    %c0_i32 = arith.constant 0 : i32
    %c0_i32_0 = arith.constant 0 : i32
    %c0_i32_1 = arith.constant 0 : i32
    return %c0_i32, %c0_i32_0 : i32, i32
  }
  func.func @transform_2(%arg0: i32) -> (i32, i32) {
    %c0_i32 = arith.constant 0 : i32
    %c0_i32_0 = arith.constant 0 : i32
    %c0_i32_1 = arith.constant 0 : i32
    return %c0_i32, %c0_i32_0 : i32, i32
  }
  func.func @transform_3(%arg0: i32) -> (i32, i32) {
    %c0_i32 = arith.constant 0 : i32
    %c0_i32_0 = arith.constant 0 : i32
    %c0_i32_1 = arith.constant 0 : i32
    return %c0_i32, %c0_i32_0 : i32, i32
  }
  func.func @transform_4(%arg0: i32) -> (i32, i32) {
    %c0_i32 = arith.constant 0 : i32
    %c0_i32_0 = arith.constant 0 : i32
    %c0_i32_1 = arith.constant 0 : i32
    return %c0_i32, %c0_i32_0 : i32, i32
  }
  func.func @transform_5(%arg0: i32) -> (i32, i32) {
    %c0_i32 = arith.constant 0 : i32
    %c0_i32_0 = arith.constant 0 : i32
    %c0_i32_1 = arith.constant 0 : i32
    return %c0_i32, %c0_i32_0 : i32, i32
  }
  func.func @transform_6(%arg0: i32) -> (i32, i32) {
    %c0_i32 = arith.constant 0 : i32
    %c0_i32_0 = arith.constant 0 : i32
    %c0_i32_1 = arith.constant 0 : i32
    return %c0_i32, %c0_i32_0 : i32, i32
  }
  func.func @transform_7(%arg0: i32) -> (i32, i32) {
    %c0_i32 = arith.constant 0 : i32
    %c0_i32_0 = arith.constant 0 : i32
    %c0_i32_1 = arith.constant 0 : i32
    return %c0_i32, %c0_i32_0 : i32, i32
  }
  func.func @transform_8(%arg0: i32) -> (i32, i32) {
    %c0_i32 = arith.constant 0 : i32
    %c0_i32_0 = arith.constant 0 : i32
    %c0_i32_1 = arith.constant 0 : i32
    return %c0_i32, %c0_i32_0 : i32, i32
  }
  func.func @transform_9(%arg0: i32) -> (i32, i32) {
    %c0_i32 = arith.constant 0 : i32
    %c0_i32_0 = arith.constant 0 : i32
    %c0_i32_1 = arith.constant 0 : i32
    return %c0_i32, %c0_i32_0 : i32, i32
  }
  func.func @transform_10(%arg0: i32) -> (i32, i32) {
    %c0_i32 = arith.constant 0 : i32
    %c0_i32_0 = arith.constant 0 : i32
    %c0_i32_1 = arith.constant 0 : i32
    return %c0_i32, %c0_i32_0 : i32, i32
  }
  func.func @transform_11(%arg0: i32) -> (i32, i32) {
    %c0_i32 = arith.constant 0 : i32
    %c0_i32_0 = arith.constant 0 : i32
    return %c0_i32, %arg0 : i32, i32
  }
}

</mosaic_0001>

<bundles_post_ra>
// kernel: tpu_custom_call.1
= control target key start
LH: loop header
LB: loop body
LE: loop exit
PB: predicated region body
PF: predicated region fallthrough
CT: control target
= control target key end

     0   :  { %v662_v1 = vmov 0.0   ;;  %vm663_vm0 = vmmov 0   ;;  %v664_v3 = vmov 0   ;;  %s820_s0 = inlined_call_operand.vmem [shape: f32[40,8], index: 0, kind: input, shape index: {}]   ;;  %s821_s1 = inlined_call_operand.vmem [shape: f32[20,40], index: 1, kind: input, shape index: {}]   ;;  %s822_s2 = inlined_call_operand.vmem [shape: f32[20,1], index: 2, kind: input, shape index: {}]   ;;  %s823_s3 = inlined_call_operand.vmem [shape: f32[10,20], index: 3, kind: input, shape index: {}]   ;;  %s824_s4 = inlined_call_operand.vmem [shape: f32[10,1], index: 4, kind: input, shape index: {}]   ;;  %s825_s5 = inlined_call_operand.vmem [shape: f32[5,10], index: 5, kind: input, shape index: {}]   ;;  %s826_s6 = inlined_call_operand.vmem [shape: f32[5,1], index: 6, kind: input, shape index: {}]   ;;  %s827_s7 = inlined_call_operand.vmem [shape: f32[2,5], index: 7, kind: input, shape index: {}]   ;;  %s828_s8 = inlined_call_operand.vmem [shape: f32[2,1], index: 8, kind: input, shape index: {}]   ;;  %s829_s9 = inlined_call_operand.vmem [shape: f32[3,2], index: 9, kind: input, shape index: {}]   ;;  %s830_s10 = inlined_call_operand.vmem [shape: f32[3,1], index: 10, kind: input, shape index: {}]   ;;  %s831_s11 = inlined_call_operand.hbm [shape: f32[3,8], index: 11, kind: output, shape index: {}]  }
   0x1   :  { %v43_v0 = vld [vmem:[%s820_s0 + $0x20] sm:$0xff]  ;;  %585 = vmatprep.subr.mxu0 %v662_v1  ;;  %v42_v2 = vld [vmem:[%s820_s0 + $0x18] sm:$0xff]  ;;  %595 = vmatprep.mubr.msk.f32.mxu0 %vm663_vm0, %v662_v1  ;;  %v49_v4 = vld [vmem:[%s822_s2 + $0x10] sm:$0xf] }
   0x2   :  { %586 = vmatpush3.msra.mxu0 %v43_v0  ;;  %634 = vset.pattern.permute.xlu0 %v664_v3  ;;  %v41_v5 = vld [vmem:[%s820_s0 + $0x10] sm:$0xff]  ;;  %v47_v6 = vld [vmem:[%s822_s2] sm:$0xff]  ;;  %v48_v7 = vld [vmem:[%s822_s2 + $0x8] sm:$0xff] }
   0x3   :  { %587 = vmatprep.subr.mxu0 %v662_v1  ;;  %62 = vperm.xlu0 %634, %v49_v4   ;;  %v40_v8 = vld [vmem:[%s820_s0 + $0x8] sm:$0xff] }
   0x4   :  { %588 = vmatpush3.msra.mxu0 %v42_v2  ;;  %635 = vset.pattern.permute.xlu1 %v664_v3 }
   0x5   :  { %589 = vmatprep.subr.mxu0 %v662_v1  ;;  %52 = vperm.xlu1 %635, %v47_v6  }
   0x6   :  { %16 = vsyncpa [#allocation3], 0  ;;  %590 = vmatpush3.msra.mxu0 %v41_v5  ;;  %v167_v9 = vld [vmem:[%s824_s4 + $0x8] sm:$0x3]  ;;  %v39_v10 = vld [vmem:[%s820_s0] sm:$0xff]  ;;  %vm65_vm1 = vcmask 326656  }
   0x7   :  { %591 = vmatprep.subr.mxu0 %v662_v1  ;;  %57 = vperm.xlu0 %634, %v48_v7   ;;  %v44_v11 = vld [vmem:[%s821_s1] sm:$0xff]  ;;  %v45_v14 = vld [vmem:[%s821_s1 + $0x8] sm:$0xff]  ;;  %v46_v17 = vld [vmem:[%s821_s1 + $0x10] sm:$0xf]  ;;  %vm178_vm2 = vcmask 162816   ;;  %vm185_vm4 = vcmask 1043456  }
   0x8   :  { %592 = vmatpush3.msra.mxu0 %v40_v8  ;;  %v166_v12 = vld [vmem:[%s824_s4] sm:$0xff]  ;;  %v165_v37 = vld [vmem:[%s823_s3 + $0x8] sm:$0x3]  ;;  %vm281_vm8 = vcmask 1041408   ;;  %vm277_vm10 = vcmask 80896   ;;  %vm369_vm12 = vcmask 1044480  }
   0x9   :  { %593 = vmatprep.subr.mxu0 %v662_v1  ;;  %175 = vperm.xlu1 %635, %v167_v9   ;;  %v271_v13 = vld [vmem:[%s826_s6] sm:$0x1f]  ;;  %vm365_vm13 = vcmask 39936   ;;  %vm453_vm15 = vcmask 15360  }
   0xa   :  { %594 = vmatpush3.msra.mxu0 %v39_v10  ;;  %v359_v15 = vld [vmem:[%s828_s8] sm:$0x3] }
   0xb   :  { %596 = vmatmul.mubr.msk.f32.vlgmr.msra.gmra.mxu0 %vm65_vm1, %v44_v11  ;;  %170 = vperm.xlu0 %634, %v166_v12   ;;  %v447_v16 = vld [vmem:[%s830_s10] sm:$0x7] }
   0xc   :  { %598 = vmatprep.mubr.msk.f32.mxu0 %vm663_vm0, %v662_v1  ;;  %v164_v18 = vld [vmem:[%s823_s3] sm:$0xff] }
   0xd   :  { %274 = vperm.xlu1 %635, %v271_v13   ;;  %610 = vmatprep.mubr.msk.f32.mxu1 %vm178_vm2, %v164_v18  ;;  %v270_v47 = vld [vmem:[%s825_s5] sm:$0x1f] }
   0xe   :  { %v358_v54 = vld [vmem:[%s827_s7] sm:$0x3]  ;;  %s665_s7 = smov [#allocation2]  }
   0xf   :  { %599 = vmatmul.mubr.msk.f32.gmra.mxu0 %vm65_vm1, %v45_v14  ;;  %362 = vperm.xlu0 %634, %v359_v15   ;;  %v446_v61 = vld [vmem:[%s829_s9] sm:$0x7]  ;;  %s544_s12 = sshll.u32 %s665_s7, 4  ;;  %s545_s12 = int_to_ptr.vmem [resolvable:$true] %s544_s12 }
  0x10   :  { %601 = vmatprep.mubr.msk.f32.mxu0 %vm663_vm0, %v662_v1  ;;  %s640_s9 = scalar_lea.vmem %s545_s12, 64  ;;  %p645_p1 = scmp.lt.s32.totalorder %s545_s12, %s545_s12 }
  0x11   :  { %450 = vperm.xlu1 %635, %v447_v16   ;;  %p641_p0 = scmp.ne.s32.totalorder %s545_s12, %s640_s9  ;;  %p646_p2 = scmp.lt.s32.totalorder %s640_s9, %s640_s9 }
  0x13   :  { %602 = vmatmul.mubr.msk.f32.gmra.mxu0 %vm65_vm1, %v46_v17  ;;  %p647_p3 = por %p646_p2, %p645_p1 }
  0x15   :  { %p648_p4 = pnand %p647_p3, %p641_p0 }
  0x7e   :  { %v63_v19 = vpop.permute.xlu0 %62 }
  0x80   :  { %v53_v23 = vpop.permute.xlu1 %52 }
  0x82   :  { %v58_v24 = vpop.permute.xlu0 %57 }
  0x84   :  { %v176_v38 = vpop.permute.xlu1 %175 }
  0x86   :  { %v171_v41 = vpop.permute.xlu0 %170 }
  0x88   :  { %v275_v49 = vpop.permute.xlu1 %274 }
  0x8a   :  { %v363_v56 = vpop.permute.xlu0 %362 }
  0x8c   :  { %v451_v63 = vpop.permute.xlu1 %450 }
  0xcb   :  { %v141_v20 = vpop.f32.mrf.mxu0 }
  0xcc   :  { %v142_v28 = vadd.f32 %v141_v20, %v53_v23 }
  0xcd   :  { %v597_v21 = vpop.f32.mrf.mxu0 }
  0xce   :  { %v158_v33 = vmul.f32 0.01, %v142_v28  ;;  %vm155_vm6 = vcmp.gt.f32.partialorder %v142_v28, 0.0 }
  0xcf   :  { %v146_v22 = vpop.f32.mrf.mxu0 }
  0xd0   :  { %v147_v26 = vadd.f32 %v146_v22, %v58_v24  ;;  %v161_v36 = vsel %vm155_vm6, %v142_v28, %v158_v33 }
  0xd1   :  { %v600_v25 = vpop.f32.mrf.mxu0 }
  0xd2   :  { %v159_v31 = vmul.f32 0.01, %v147_v26  ;;  %vm156_vm5 = vcmp.gt.f32.partialorder %v147_v26, 0.0 }
  0xd3   :  { %v151_v27 = vpop.f32.mrf.mxu0 }
  0xd4   :  { %v152_v29 = vadd.f32 %v151_v27, %v63_v19  ;;  %v162_v35 = vsel %vm156_vm5, %v147_v26, %v159_v31 }
  0xd5   :  { %v603_v30 = vpop.f32.mrf.mxu0 }
  0xd6   :  { %vm157_vm3 = vcmp.gt.f32.partialorder %v152_v29, 0.0  ;;  %v160_v32 = vmul.f32 0.01, %v152_v29 }
  0xd8   :  { %v163_v34 = vsel %vm157_vm3, %v152_v29, %v160_v32 }
  0xd9   :  { %604 = vmatprep.subr.msk.mxu1 %vm185_vm4, %v163_v34 }
  0xda   :  { %605 = vmatpush3.msk.msra.mxu1 %vm185_vm4, %v163_v34 }
  0xdb   :  { %606 = vmatprep.subr.mxu1 %v162_v35 }
  0xdc   :  { %607 = vmatpush3.msra.mxu1 %v162_v35 }
  0xdd   :  { %608 = vmatprep.subr.mxu1 %v161_v36 }
  0xde   :  { %609 = vmatpush3.msra.mxu1 %v161_v36 }
  0xdf   :  { %611 = vmatmul.mubr.msk.f32.vlgmr.msra.gmra.mxu1 %vm178_vm2, %v165_v37  ;;  %613 = vmatprep.subr.mxu1 %v662_v1 }
  0xe0   :  { %617 = vmatprep.mubr.msk.f32.mxu1 %vm663_vm0, %v662_v1 }
 0x19f   :  { %v612_v39 = vpop.f32.mrf.mxu1 }
 0x1a0   :  { %v261_v40 = vadd.f32 %v612_v39, %v176_v38 }
 0x1a1   :  { %v255_v42 = vpop.f32.mrf.mxu1 }
 0x1a2   :  { %vm265_vm7 = vcmp.gt.f32.partialorder %v261_v40, 0.0  ;;  %v267_v43 = vmul.f32 0.01, %v261_v40  ;;  %v256_v44 = vadd.f32 %v255_v42, %v171_v41 }
 0x1a4   :  { %v269_v45 = vsel %vm265_vm7, %v261_v40, %v267_v43  ;;  %vm264_vm9 = vcmp.gt.f32.partialorder %v256_v44, 0.0  ;;  %v266_v46 = vmul.f32 0.01, %v256_v44 }
 0x1a5   :  { %614 = vmatpush3.msk.msra.mxu1 %vm281_vm8, %v269_v45 }
 0x1a6   :  { %615 = vmatprep.subr.mxu1 %v662_v1  ;;  %v268_v48 = vsel %vm264_vm9, %v256_v44, %v266_v46 }
 0x1a7   :  { %616 = vmatpush3.msra.mxu1 %v268_v48 }
 0x1a8   :  { %618 = vmatmul.mubr.msk.f32.vlgmr.msra.gmra.mxu1 %vm277_vm10, %v270_v47  ;;  %620 = vmatprep.subr.mxu1 %v662_v1 }
 0x1a9   :  { %622 = vmatprep.mubr.msk.f32.mxu1 %vm663_vm0, %v662_v1 }
 0x268   :  { %v351_v50 = vpop.f32.mrf.mxu1 }
 0x269   :  { %v352_v51 = vadd.f32 %v351_v50, %v275_v49 }
 0x26a   :  { %v619_v52 = vpop.f32.mrf.mxu1 }
 0x26b   :  { %vm355_vm11 = vcmp.gt.f32.partialorder %v352_v51, 0.0  ;;  %v356_v53 = vmul.f32 0.01, %v352_v51 }
 0x26d   :  { %v357_v55 = vsel %vm355_vm11, %v352_v51, %v356_v53 }
 0x26e   :  { %621 = vmatpush3.msk.msra.mxu1 %vm369_vm12, %v357_v55 }
 0x26f   :  { %623 = vmatmul.mubr.msk.f32.vlgmr.msra.gmra.mxu1 %vm365_vm13, %v358_v54  ;;  %625 = vmatprep.subr.mxu1 %v662_v1 }
 0x270   :  { %627 = vmatprep.mubr.msk.f32.mxu1 %vm663_vm0, %v662_v1  ;;  %vm536_vm0 = vcmask 59392  }
 0x32f   :  { %v439_v57 = vpop.f32.mrf.mxu1 }
 0x330   :  { %v440_v58 = vadd.f32 %v439_v57, %v363_v56 }
 0x331   :  { %v624_v59 = vpop.f32.mrf.mxu1 }
 0x332   :  { %vm443_vm14 = vcmp.gt.f32.partialorder %v440_v58, 0.0  ;;  %v444_v60 = vmul.f32 0.01, %v440_v58 }
 0x334   :  { %v445_v62 = vsel %vm443_vm14, %v440_v58, %v444_v60 }
 0x335   :  { %626 = vmatpush3.msk.msra.mxu1 %vm281_vm8, %v445_v62 }
 0x336   :  { %628 = vmatmul.mubr.msk.f32.vlgmr.msra.gmra.mxu1 %vm453_vm15, %v446_v61 }
 0x3f6   :  { %v526_v0 = vpop.f32.mrf.mxu1 }
 0x3f7   :  { %v527_v2 = vadd.f32 %v526_v0, %v451_v63 }
 0x3f8   :  { %v629_v3 = vpop.f32.mrf.mxu1 }
 0x3f9   :  { %v564_v1 = vmul.f32 -1.442695, %v527_v2 }
 0x3fb   :  { %636 = vpow2.f32 %v564_v1 }
 0x408   :  { %v637_v4 = vpop.eup %636 }
 0x409   :  { %v533_v5 = vadd.f32 1.0, %v637_v4 }
 0x40b   :  { %638 = vrcp.f32 %v533_v5 }
 0x418   :  { %v639_v6 = vpop.eup %638 }
 0x419   :  { %537 = vst.msk [vmem:[#allocation2] sm:$0x7] %vm536_vm0, %v639_v6 }
 0x41a   :  { %651 = shalt.err (!%p648_p4)
}
 0x41b   :  { %547 = dma.vmem_to_hbm [thread:$0]  %s545_s12, 64, %s831_s11, [#allocation3]  }
 0x41c   :  { %660 = dma.done.wait [#allocation3], 64  }
 0x41d   :  { %661 = vsyncadd [#allocation3], 4294967232 }
 0x41e   :  { %551 = vsyncpa [#allocation3], 1 }

</bundles_post_ra>
